<compile_context>
chip_gen: v5e
topology: v5e:2x2
jax: 0.10.0
libtpu: 0.0.40
codegen_flags: <defaults>
</compile_context>

<pallas_src>
import jax
import jax.numpy as jnp
from jax.experimental import pallas as pl
from jax.experimental.pallas import tpu as pltpu


def calculator_kernel(x1_ref, x2_ref, op_ref,
                      wd1_ref, bd1_ref,
                      wa_ref, wb_ref, wop_ref, bc1_ref,
                      wc2_ref, bc2_ref,
                      out_ref):
    tb = x1_ref.shape[0]

    # --- model_digits layer 1, both images stacked along the sublane axis ---
    x12 = jnp.concatenate([x1_ref[...], x2_ref[...]], axis=0)        # (2TB, 256) bf16
    h12 = jnp.dot(x12, wd1_ref[...],
                  preferred_element_type=jnp.float32) + bd1_ref[...]  # (2TB, 32) f32
    h12 = jnp.maximum(h12, 0.0).astype(jnp.bfloat16)

    ha = h12[:tb]   # rows of image 1
    hb = h12[tb:]   # rows of image 2

    # --- classifier Linear(24, 240) with model_digits layer 2 folded in ---
    # (mathematically identical to cat([a, b, op]) @ wc1 + bc1)
    h = (jnp.dot(ha, wa_ref[...], preferred_element_type=jnp.float32)
         + jnp.dot(hb, wb_ref[...], preferred_element_type=jnp.float32)
         + jnp.dot(op_ref[...], wop_ref[...], preferred_element_type=jnp.float32)
         + bc1_ref[...])
    h = jnp.maximum(h, 0.0).astype(jnp.bfloat16)                      # (TB, 240)

    # --- classifier Linear(240, 96) padded to 128 lanes + LogSoftmax ---
    logits = jnp.dot(h, wc2_ref[...],
                     preferred_element_type=jnp.float32) + bc2_ref[...]  # (TB, 128)
    # padded lanes carry bias -1e30 -> exp underflows to 0, so the reduction
    # over 128 lanes equals the reduction over the real 96 lanes.
    m = jnp.max(logits, axis=1, keepdims=True)
    shifted = logits - m
    lse = jnp.log(jnp.sum(jnp.exp(shifted), axis=1, keepdims=True))
    out_ref[...] = shifted - lse


def _round_up(x, m):
    return (x + m - 1) // m * m


def calculator_forward(data_1, data_2, op, params):
    """data_1, data_2: (B, 1, 16, 16) NCHW; op: (B, 4) one-hot. Returns (B, 96)."""
    B = data_1.shape[0]
    x1 = data_1.reshape(B, -1).astype(jnp.float32)   # (B, 256)
    x2 = data_2.reshape(B, -1).astype(jnp.float32)   # (B, 256)
    opf = op.reshape(B, -1).astype(jnp.float32)      # (B, 4)

    wd1, bd1, wd2, bd2, wc1, bc1, wc2, bc2 = params

    # --- offline weight folding (f32), then cast streamed weights to bf16 ---
    wc1a, wc1b, wc1o = wc1[0:10, :], wc1[10:20, :], wc1[20:24, :]
    wa = (wd2 @ wc1a)                                 # (32, 240)
    wb = (wd2 @ wc1b)                                 # (32, 240)
    bc1p = bc1 + bd2 @ wc1a + bd2 @ wc1b              # (1, 240)

    # output padded to 128 lanes; padded lanes get a very negative bias so the
    # in-kernel log-softmax ignores them.
    wc2p = jnp.concatenate([wc2, jnp.zeros((wc2.shape[0], 32), jnp.float32)], axis=1)
    bc2p = jnp.concatenate([bc2, jnp.full((1, 32), -1e30, jnp.float32)], axis=1)

    wd1_b = wd1.astype(jnp.bfloat16)
    wa_b = wa.astype(jnp.bfloat16)
    wb_b = wb.astype(jnp.bfloat16)
    wc2_b = wc2p.astype(jnp.bfloat16)

    # --- batch tiling ---
    TB = 1024 if B >= 1024 else _round_up(B, 8)
    B_pad = _round_up(B, TB)
    pad = B_pad - B
    x1p = jnp.pad(x1, ((0, pad), (0, 0))).astype(jnp.bfloat16)
    x2p = jnp.pad(x2, ((0, pad), (0, 0))).astype(jnp.bfloat16)
    opp = jnp.pad(opf, ((0, pad), (0, 0)))           # kept f32 (tiny K=4 matmul)

    grid = (pl.cdiv(B_pad, TB),)

    def stream_spec(cols):
        return pl.BlockSpec((TB, cols), lambda i: (i, 0))

    def resident_spec(w):
        return pl.BlockSpec(w.shape, lambda i: (0, 0))

    args = (x1p, x2p, opp, wd1_b, bd1, wa_b, wb_b, wc1o, bc1p, wc2_b, bc2p)
    in_specs = [
        stream_spec(256),          # x1
        stream_spec(256),          # x2
        stream_spec(4),            # op
        resident_spec(wd1_b),      # wd1
        resident_spec(bd1),        # bd1
        resident_spec(wa_b),       # Wa (wd2 folded into wc1[0:10])
        resident_spec(wb_b),       # Wb (wd2 folded into wc1[10:20])
        resident_spec(wc1o),       # op-part of wc1
        resident_spec(bc1p),       # folded classifier bias
        resident_spec(wc2_b),      # wc2 padded to 128 cols
        resident_spec(bc2p),       # bc2 padded to 128 cols
    ]

    out_pad = pl.pallas_call(
        calculator_kernel,
        out_shape=jax.ShapeDtypeStruct((B_pad, 128), jnp.float32),
        grid=grid,
        in_specs=in_specs,
        out_specs=pl.BlockSpec((TB, 128), lambda i: (i, 0)),
        compiler_params=pltpu.CompilerParams(
            dimension_semantics=("parallel",),
            vmem_limit_bytes=32 * 1024 * 1024),
    )(*args)

    return out_pad[:B, :96]


def make_params(key):
    ks = jax.random.split(key, 8)

    def lin(kw, kb, fan_in, fan_out):
        w = jax.random.normal(kw, (fan_in, fan_out), jnp.float32) * (1.0 / jnp.sqrt(fan_in))
        b = jax.random.normal(kb, (1, fan_out), jnp.float32) * 0.01
        return w, b

    wd1, bd1 = lin(ks[0], ks[1], 256, 32)   # model_digits layer 1
    wd2, bd2 = lin(ks[2], ks[3], 32, 10)    # model_digits layer 2
    wc1, bc1 = lin(ks[4], ks[5], 24, 240)   # classifier Linear(24, 240)
    wc2, bc2 = lin(ks[6], ks[7], 240, 96)   # classifier Linear(240, 96)
    return (wd1, bd1, wd2, bd2, wc1, bc1, wc2, bc2)


def reference_forward(data_1, data_2, op, params):
    """Pure-f32 JAX reference with the original (un-folded) module semantics."""
    wd1, bd1, wd2, bd2, wc1, bc1, wc2, bc2 = params
    B = data_1.shape[0]

    def digits(x):
        h = jnp.maximum(x.reshape(B, -1) @ wd1 + bd1, 0.0)
        return h @ wd2 + bd2

    a = digits(data_1)
    b = digits(data_2)
    x = jnp.concatenate([a, b, op.reshape(B, -1)], axis=1)
    h = jnp.maximum(x @ wc1 + bc1, 0.0)
    logits = h @ wc2 + bc2
    return jax.nn.log_softmax(logits, axis=1)


if __name__ == "__main__":
    key = jax.random.PRNGKey(0)
    k_p, k_d1, k_d2, k_op = jax.random.split(key, 4)

    B = 2
    params = make_params(k_p)
    data_1 = jax.random.normal(k_d1, (B, 1, 16, 16), jnp.float32)
    data_2 = jax.random.normal(k_d2, (B, 1, 16, 16), jnp.float32)
    op_idx = jax.random.randint(k_op, (B,), 0, 4)
    op = jax.nn.one_hot(op_idx, 4, dtype=jnp.float32)  # (B, 4)

    out = calculator_forward(data_1, data_2, op, params)
    out = jax.block_until_ready(out)

    ref = reference_forward(data_1, data_2, op, params)
    assert out.shape == (B, 96), out.shape
    # bf16 operands (f32 accumulation) vs. pure-f32 reference -> loose tolerance.
    max_err = float(jnp.max(jnp.abs(out - ref)))
    assert jnp.allclose(out, ref, atol=1e-1, rtol=1e-2), max_err

    print("KERNEL_OK")
</pallas_src>

<mosaic_0001>
module attributes {stable_mosaic.version = 11 : i64} {
  func.func @calculator_kernel(%arg0: i32, %arg1: memref<8x256xbf16, #tpu.memory_space<vmem>>, %arg2: memref<8x256xbf16, #tpu.memory_space<vmem>>, %arg3: memref<8x4xf32, #tpu.memory_space<vmem>>, %arg4: memref<256x32xbf16, #tpu.memory_space<vmem>>, %arg5: memref<1x32xf32, #tpu.memory_space<vmem>>, %arg6: memref<32x240xbf16, #tpu.memory_space<vmem>>, %arg7: memref<32x240xbf16, #tpu.memory_space<vmem>>, %arg8: memref<4x240xf32, #tpu.memory_space<vmem>>, %arg9: memref<1x240xf32, #tpu.memory_space<vmem>>, %arg10: memref<240x128xbf16, #tpu.memory_space<vmem>>, %arg11: memref<1x128xf32, #tpu.memory_space<vmem>>, %arg12: memref<8x128xf32, #tpu.memory_space<vmem>>) attributes {dimension_semantics = [#tpu.dimension_semantics<parallel>], iteration_bounds = array<i64: 1>, scalar_prefetch = 0 : i64, scratch_operands = 0 : i64, tpu.core_type = #tpu.core_type<tc>, window_params = [{transform_indices = @transform_0, window_bounds = array<i64: 8, 256>}, {transform_indices = @transform_1, window_bounds = array<i64: 8, 256>}, {transform_indices = @transform_2, window_bounds = array<i64: 8, 4>}, {pipeline_mode = #tpu.pipeline_mode<synchronous>, transform_indices = @transform_3, window_bounds = array<i64: 256, 32>}, {pipeline_mode = #tpu.pipeline_mode<synchronous>, transform_indices = @transform_4, window_bounds = array<i64: 1, 32>}, {pipeline_mode = #tpu.pipeline_mode<synchronous>, transform_indices = @transform_5, window_bounds = array<i64: 32, 240>}, {pipeline_mode = #tpu.pipeline_mode<synchronous>, transform_indices = @transform_6, window_bounds = array<i64: 32, 240>}, {pipeline_mode = #tpu.pipeline_mode<synchronous>, transform_indices = @transform_7, window_bounds = array<i64: 4, 240>}, {pipeline_mode = #tpu.pipeline_mode<synchronous>, transform_indices = @transform_8, window_bounds = array<i64: 1, 240>}, {pipeline_mode = #tpu.pipeline_mode<synchronous>, transform_indices = @transform_9, window_bounds = array<i64: 240, 128>}, {pipeline_mode = #tpu.pipeline_mode<synchronous>, transform_indices = @transform_10, window_bounds = array<i64: 1, 128>}, {transform_indices = @transform_11, window_bounds = array<i64: 8, 128>}]} {
    %c0 = arith.constant 0 : index
    %c0_0 = arith.constant 0 : index
    %0 = vector.load %arg1[%c0, %c0_0] : memref<8x256xbf16, #tpu.memory_space<vmem>>, vector<8x256xbf16>
    %c0_1 = arith.constant 0 : index
    %c0_2 = arith.constant 0 : index
    %1 = vector.load %arg2[%c0_1, %c0_2] : memref<8x256xbf16, #tpu.memory_space<vmem>>, vector<8x256xbf16>
    %2 = tpu.concatenate %0, %1 in 0 : vector<8x256xbf16>, vector<8x256xbf16> -> vector<16x256xbf16>
    %c0_3 = arith.constant 0 : index
    %c0_4 = arith.constant 0 : index
    %3 = vector.load %arg4[%c0_3, %c0_4] : memref<256x32xbf16, #tpu.memory_space<vmem>>, vector<256x32xbf16>
    %cst = arith.constant dense<0.000000e+00> : vector<16x32xf32>
    %4 = tpu.matmul %2, %3, %cst {dimension_numbers = #tpu.dot_dimension_numbers<[1], [0], [0], [1], [0, 0, 1, 1], [], []>} : vector<16x256xbf16>, vector<256x32xbf16>, vector<16x32xf32> -> vector<16x32xf32>
    %c0_5 = arith.constant 0 : index
    %c0_6 = arith.constant 0 : index
    %5 = vector.load %arg5[%c0_5, %c0_6] : memref<1x32xf32, #tpu.memory_space<vmem>>, vector<1x32xf32>
    %6 = vector.broadcast %5 : vector<1x32xf32> to vector<16x32xf32>
    %7 = arith.addf %4, %6 : vector<16x32xf32>
    %cst_7 = arith.constant 0.000000e+00 : f32
    %8 = vector.broadcast %cst_7 : f32 to vector<16x32xf32>
    %9 = arith.maximumf %7, %8 : vector<16x32xf32>
    %10 = arith.truncf %9 : vector<16x32xf32> to vector<16x32xbf16>
    %11 = vector.extract_strided_slice %10 {offsets = [0, 0], sizes = [8, 32], strides = [1, 1]} : vector<16x32xbf16> to vector<8x32xbf16>
    %12 = vector.extract_strided_slice %10 {offsets = [8, 0], sizes = [8, 32], strides = [1, 1]} : vector<16x32xbf16> to vector<8x32xbf16>
    %c0_8 = arith.constant 0 : index
    %c0_9 = arith.constant 0 : index
    %13 = vector.load %arg6[%c0_8, %c0_9] : memref<32x240xbf16, #tpu.memory_space<vmem>>, vector<32x240xbf16>
    %cst_10 = arith.constant dense<0.000000e+00> : vector<8x240xf32>
    %14 = tpu.matmul %11, %13, %cst_10 {dimension_numbers = #tpu.dot_dimension_numbers<[1], [0], [0], [1], [0, 0, 1, 1], [], []>} : vector<8x32xbf16>, vector<32x240xbf16>, vector<8x240xf32> -> vector<8x240xf32>
    %c0_11 = arith.constant 0 : index
    %c0_12 = arith.constant 0 : index
    %15 = vector.load %arg7[%c0_11, %c0_12] : memref<32x240xbf16, #tpu.memory_space<vmem>>, vector<32x240xbf16>
    %cst_13 = arith.constant dense<0.000000e+00> : vector<8x240xf32>
    %16 = tpu.matmul %12, %15, %cst_13 {dimension_numbers = #tpu.dot_dimension_numbers<[1], [0], [0], [1], [0, 0, 1, 1], [], []>} : vector<8x32xbf16>, vector<32x240xbf16>, vector<8x240xf32> -> vector<8x240xf32>
    %17 = arith.addf %14, %16 : vector<8x240xf32>
    %c0_14 = arith.constant 0 : index
    %c0_15 = arith.constant 0 : index
    %18 = vector.load %arg3[%c0_14, %c0_15] : memref<8x4xf32, #tpu.memory_space<vmem>>, vector<8x4xf32>
    %c0_16 = arith.constant 0 : index
    %c0_17 = arith.constant 0 : index
    %19 = vector.load %arg8[%c0_16, %c0_17] : memref<4x240xf32, #tpu.memory_space<vmem>>, vector<4x240xf32>
    %cst_18 = arith.constant dense<0.000000e+00> : vector<8x240xf32>
    %20 = tpu.matmul %18, %19, %cst_18 {dimension_numbers = #tpu.dot_dimension_numbers<[1], [0], [0], [1], [0, 0, 1, 1], [], []>} : vector<8x4xf32>, vector<4x240xf32>, vector<8x240xf32> -> vector<8x240xf32>
    %21 = arith.addf %17, %20 : vector<8x240xf32>
    %c0_19 = arith.constant 0 : index
    %c0_20 = arith.constant 0 : index
    %22 = vector.load %arg9[%c0_19, %c0_20] : memref<1x240xf32, #tpu.memory_space<vmem>>, vector<1x240xf32>
    %23 = vector.broadcast %22 : vector<1x240xf32> to vector<8x240xf32>
    %24 = arith.addf %21, %23 : vector<8x240xf32>
    %cst_21 = arith.constant 0.000000e+00 : f32
    %25 = vector.broadcast %cst_21 : f32 to vector<8x240xf32>
    %26 = arith.maximumf %24, %25 : vector<8x240xf32>
    %27 = arith.truncf %26 : vector<8x240xf32> to vector<8x240xbf16>
    %c0_22 = arith.constant 0 : index
    %c0_23 = arith.constant 0 : index
    %28 = vector.load %arg10[%c0_22, %c0_23] : memref<240x128xbf16, #tpu.memory_space<vmem>>, vector<240x128xbf16>
    %cst_24 = arith.constant dense<0.000000e+00> : vector<8x128xf32>
    %29 = tpu.matmul %27, %28, %cst_24 {dimension_numbers = #tpu.dot_dimension_numbers<[1], [0], [0], [1], [0, 0, 1, 1], [], []>} : vector<8x240xbf16>, vector<240x128xbf16>, vector<8x128xf32> -> vector<8x128xf32>
    %c0_25 = arith.constant 0 : index
    %c0_26 = arith.constant 0 : index
    %30 = vector.load %arg11[%c0_25, %c0_26] : memref<1x128xf32, #tpu.memory_space<vmem>>, vector<1x128xf32>
    %31 = vector.broadcast %30 : vector<1x128xf32> to vector<8x128xf32>
    %32 = arith.addf %29, %31 : vector<8x128xf32>
    %cst_27 = arith.constant dense<0xFF800000> : vector<8xf32>
    %33 = vector.multi_reduction <maximumf>, %32, %cst_27 [1] : vector<8x128xf32> to vector<8xf32>
    %34 = vector.shape_cast %33 : vector<8xf32> to vector<8x1xf32>
    %35 = vector.broadcast %34 : vector<8x1xf32> to vector<8x128xf32>
    %36 = arith.subf %32, %35 : vector<8x128xf32>
    %37 = math.exp %36 : vector<8x128xf32>
    %cst_28 = arith.constant dense<0.000000e+00> : vector<8xf32>
    %38 = vector.multi_reduction <add>, %37, %cst_28 [1] : vector<8x128xf32> to vector<8xf32>
    %39 = vector.shape_cast %38 : vector<8xf32> to vector<8x1xf32>
    %40 = math.log %39 : vector<8x1xf32>
    %41 = vector.broadcast %40 : vector<8x1xf32> to vector<8x128xf32>
    %42 = arith.subf %36, %41 : vector<8x128xf32>
    %c0_29 = arith.constant 0 : index
    %c0_30 = arith.constant 0 : index
    %43 = vector.load %arg12[%c0_29, %c0_30] : memref<8x128xf32, #tpu.memory_space<vmem>>, vector<8x128xf32>
    tpu.vector_store %arg12[%c0_29, %c0_30], %42 {strides = array<i32>} : memref<8x128xf32, #tpu.memory_space<vmem>>, vector<8x128xf32>,
    return
  }
  func.func @transform_0(%arg0: i32) -> (i32, i32) {
    %c0_i32 = arith.constant 0 : i32
    %c0_i32_0 = arith.constant 0 : i32
    return %arg0, %c0_i32 : i32, i32
  }
  func.func @transform_1(%arg0: i32) -> (i32, i32) {
    %c0_i32 = arith.constant 0 : i32
    %c0_i32_0 = arith.constant 0 : i32
    return %arg0, %c0_i32 : i32, i32
  }
  func.func @transform_2(%arg0: i32) -> (i32, i32) {
    %c0_i32 = arith.constant 0 : i32
    %c0_i32_0 = arith.constant 0 : i32
    return %arg0, %c0_i32 : i32, i32
  }
  func.func @transform_3(%arg0: i32) -> (i32, i32) {
    %c0_i32 = arith.constant 0 : i32
    %c0_i32_0 = arith.constant 0 : i32
    %c0_i32_1 = arith.constant 0 : i32
    return %c0_i32, %c0_i32_0 : i32, i32
  }
  func.func @transform_4(%arg0: i32) -> (i32, i32) {
    %c0_i32 = arith.constant 0 : i32
    %c0_i32_0 = arith.constant 0 : i32
    %c0_i32_1 = arith.constant 0 : i32
    return %c0_i32, %c0_i32_0 : i32, i32
  }
  func.func @transform_5(%arg0: i32) -> (i32, i32) {
    %c0_i32 = arith.constant 0 : i32
    %c0_i32_0 = arith.constant 0 : i32
    %c0_i32_1 = arith.constant 0 : i32
    return %c0_i32, %c0_i32_0 : i32, i32
  }
  func.func @transform_6(%arg0: i32) -> (i32, i32) {
    %c0_i32 = arith.constant 0 : i32
    %c0_i32_0 = arith.constant 0 : i32
    %c0_i32_1 = arith.constant 0 : i32
    return %c0_i32, %c0_i32_0 : i32, i32
  }
  func.func @transform_7(%arg0: i32) -> (i32, i32) {
    %c0_i32 = arith.constant 0 : i32
    %c0_i32_0 = arith.constant 0 : i32
    %c0_i32_1 = arith.constant 0 : i32
    return %c0_i32, %c0_i32_0 : i32, i32
  }
  func.func @transform_8(%arg0: i32) -> (i32, i32) {
    %c0_i32 = arith.constant 0 : i32
    %c0_i32_0 = arith.constant 0 : i32
    %c0_i32_1 = arith.constant 0 : i32
    return %c0_i32, %c0_i32_0 : i32, i32
  }
  func.func @transform_9(%arg0: i32) -> (i32, i32) {
    %c0_i32 = arith.constant 0 : i32
    %c0_i32_0 = arith.constant 0 : i32
    %c0_i32_1 = arith.constant 0 : i32
    return %c0_i32, %c0_i32_0 : i32, i32
  }
  func.func @transform_10(%arg0: i32) -> (i32, i32) {
    %c0_i32 = arith.constant 0 : i32
    %c0_i32_0 = arith.constant 0 : i32
    %c0_i32_1 = arith.constant 0 : i32
    return %c0_i32, %c0_i32_0 : i32, i32
  }
  func.func @transform_11(%arg0: i32) -> (i32, i32) {
    %c0_i32 = arith.constant 0 : i32
    %c0_i32_0 = arith.constant 0 : i32
    return %arg0, %c0_i32 : i32, i32
  }
}

</mosaic_0001>

<bundles_post_ra>
// kernel: tpu_custom_call.1
= control target key start
LH: loop header
LB: loop body
LE: loop exit
PB: predicated region body
PF: predicated region fallthrough
CT: control target
= control target key end

     0   :  { %16 = vsyncpa [#allocation3], 0  ;;  %s1076_s0 = inlined_call_operand.vmem [shape: bf16[8,256], index: 0, kind: input, shape index: {}]   ;;  %s1077_s1 = inlined_call_operand.vmem [shape: bf16[8,256], index: 1, kind: input, shape index: {}]   ;;  %s1078_s2 = inlined_call_operand.vmem [shape: f32[8,4], index: 2, kind: input, shape index: {}]   ;;  %s1079_s3 = inlined_call_operand.vmem [shape: bf16[256,32], index: 3, kind: input, shape index: {}]   ;;  %s1080_s4 = inlined_call_operand.vmem [shape: f32[1,32], index: 4, kind: input, shape index: {}]   ;;  %s1081_s5 = inlined_call_operand.vmem [shape: bf16[32,240], index: 5, kind: input, shape index: {}]   ;;  %s1082_s6 = inlined_call_operand.hbm [shape: bf16[32,240], index: 6, kind: input, shape index: {}]   ;;  %s1083_s7 = inlined_call_operand.vmem [shape: f32[4,240], index: 7, kind: input, shape index: {}]   ;;  %s1084_s8 = inlined_call_operand.vmem [shape: f32[1,240], index: 8, kind: input, shape index: {}]   ;;  %s1085_s9 = inlined_call_operand.vmem [shape: bf16[240,128], index: 9, kind: input, shape index: {}]   ;;  %s1086_s10 = inlined_call_operand.vmem [shape: f32[1,128], index: 10, kind: input, shape index: {}]   ;;  %s1087_s11 = inlined_call_operand.hbm [shape: f32[8,128], index: 11, kind: output, shape index: {}]  }
   0x1   :  { %17 = vsyncpa [#allocation4], 0  ;;  %s34_s19 = sshll.u32 %s1082_s6, 4  ;;  %s864_s20 = smov [#allocation2]   ;;  %s35_s19 = int_to_ptr.hbm [resolvable:$true] %s34_s19 }
   0x2   :  { %s36_s21 = sshll.u32 %s864_s20, 4  ;;  %s865_s22 = smov 128   ;;  %s37_s21 = int_to_ptr.vmem [resolvable:$true] %s36_s21 }
   0x3   :  { %s866_s23 = smov 8  }
   0x4   :  { %42 = dma.hbm_to_vmem [thread:$0]  %s35_s19, 512, %s37_s21, [#allocation3], %s865_s22, %s865_s22, %s866_s23  }
   0x5   :  { %860 = dma.done.wait [#allocation3], 512  }
   0x6   :  { %861 = vsyncadd [#allocation3], 4294966784  ;;  %v770_v0 = vld [vmem:[%s1079_s3 + $0x38] sm:$0xff]  ;;  %v769_v2 = vld [vmem:[%s1079_s3 + $0x30] sm:$0xff]  ;;  %vm68_vm0 = vcmask 1043456   ;;  %vm269_vm1 = vcmask 261120  }
   0x7   :  { %v778_v1 = vld [vmem:[%s1079_s3 + $0x78] sm:$0xff]  ;;  %209 = vmatpush.bf16.msra.mxu0 %v770_v0  ;;  %v777_v3 = vld [vmem:[%s1079_s3 + $0x70] sm:$0xff]  ;;  %v768_v4 = vld [vmem:[%s1079_s3 + $0x28] sm:$0xff]  ;;  %vm354_vm2 = vcmask 31744   ;;  %vm540_vm3 = vcmask 916480   ;;  %s588_s20 = sshll.u32 %s1087_s11, 4  ;;  %s589_s20 = int_to_ptr.hbm [resolvable:$true] %s588_s20 }
   0x8   :  { %223 = vmatpush.bf16.msra.mxu1 %v778_v1  ;;  %v776_v5 = vld [vmem:[%s1079_s3 + $0x68] sm:$0xff]  ;;  %v767_v6 = vld [vmem:[%s1079_s3 + $0x20] sm:$0xff]  ;;  %v766_v8 = vld [vmem:[%s1079_s3 + $0x18] sm:$0xff] }
   0x9   :  { %v775_v7 = vld [vmem:[%s1079_s3 + $0x60] sm:$0xff]  ;;  %v774_v9 = vld [vmem:[%s1079_s3 + $0x58] sm:$0xff]  ;;  %v765_v10 = vld [vmem:[%s1079_s3 + $0x10] sm:$0xff] }
   0xa   :  { %v773_v11 = vld [vmem:[%s1079_s3 + $0x50] sm:$0xff]  ;;  %v56_v12 = vld [vmem:[%s1076_s0] sm:$0xff]  ;;  %v764_v15 = vld [vmem:[%s1079_s3 + $0x8] sm:$0xff] }
   0xb   :  { %210 = vmatpush.bf16.msra.mxu0 %v769_v2  ;;  %v57_v13 = vld [vmem:[%s1077_s1] sm:$0xff]  ;;  %v59_v14 = vunpack.c.l.b16 %v56_v12  ;;  %v772_v16 = vld [vmem:[%s1079_s3 + $0x48] sm:$0xff]  ;;  %v60_v18 = vunpack.c.h.b16 %v56_v12  ;;  %v672_v28 = vld [vmem:[#allocation2 + $0x10] sm:$0xf] }
   0xc   :  { %224 = vmatpush.bf16.msra.mxu1 %v777_v3  ;;  %v64_v17 = vunpack.c.l.b16 %v57_v13  ;;  %v65_v19 = vunpack.c.h.b16 %v57_v13  ;;  %v763_v21 = vld [vmem:[%s1079_s3] sm:$0xff]  ;;  %v785_v30 = vld [vmem:[#allocation2 + $0x14] sm:$0xf]  ;;  %v664_v34 = vld [vmem:[#allocation2] sm:$0xf] }
   0xd   :  { %v61_v20 = vpack.c.b16 %v59_v14, %v59_v14  ;;  %v771_v22 = vld [vmem:[%s1079_s3 + $0x40] sm:$0xff]  ;;  %v62_v24 = vpack.c.b16 %v60_v18, %v60_v18  ;;  %v784_v35 = vld [vmem:[#allocation2 + $0x4] sm:$0xf0]  ;;  %v783_v36 = vld [vmem:[#allocation2 + $0x4] sm:$0xf] }
   0xe   :  { %v66_v23 = vpack.c.b16 %v64_v17, %v64_v17  ;;  %v67_v25 = vpack.c.b16 %v65_v19, %v65_v19  ;;  %v786_v29 = vld [vmem:[#allocation2 + $0x14] sm:$0xf0]  ;;  %v674_v32 = vld [vmem:[#allocation2 + $0x18] sm:$0xf0]  ;;  %v665_v37 = vor.u32 %v784_v35, %v664_v34  ;;  %v666_v38 = vld [vmem:[#allocation2 + $0x8] sm:$0xf0] }
   0xf   :  { %211 = vmatpush.bf16.msra.mxu0 %v768_v4  ;;  %v673_v31 = vor.u32 %v786_v29, %v672_v28  ;;  %v677_v33 = vor.u32 %v785_v30, %v674_v32  ;;  %v669_v39 = vor.u32 %v783_v36, %v666_v38  ;;  %v690_v40 = vld [vmem:[%s1081_s5 + $0x10] sm:$0xf]  ;;  %v782_v41 = vld [vmem:[%s1081_s5 + $0x14] sm:$0xf0]  ;;  %v781_v42 = vld [vmem:[%s1081_s5 + $0x14] sm:$0xf] }
  0x10   :  { %225 = vmatpush.bf16.msra.mxu1 %v776_v5  ;;  %v71_v26 = vsel %vm68_vm0, %v61_v20, %v66_v23  ;;  %v75_v27 = vsel %vm68_vm0, %v62_v24, %v67_v25  ;;  %v691_v43 = vor.u32 %v782_v41, %v690_v40  ;;  %v692_v44 = vld [vmem:[%s1081_s5 + $0x18] sm:$0xf0]  ;;  %v682_v45 = vld [vmem:[%s1081_s5] sm:$0xf]  ;;  %v780_v46 = vld [vmem:[%s1081_s5 + $0x4] sm:$0xf0] }
  0x11   :  { %279 = vmatpush.bf16.msra.mxu2 %v673_v31  ;;  %292 = vmatpush.bf16.msra.mxu3 %v677_v33  ;;  %v695_v47 = vor.u32 %v781_v42, %v692_v44  ;;  %v779_v48 = vld [vmem:[%s1081_s5 + $0x4] sm:$0xf]  ;;  %v684_v49 = vld [vmem:[%s1081_s5 + $0x8] sm:$0xf0]  ;;  %v683_v50 = vor.u32 %v780_v46, %v682_v45  ;;  %v806_v55 = vld [vmem:[%s1080_s4] ss:$0 sm:$0xff] }
  0x12   :  { %v687_v51 = vor.u32 %v779_v48, %v684_v49  ;;  %v349_v54 = vld [vmem:[%s1083_s7] sm:$0xff]  ;;  %v794_v5 = vld [vmem:[%s1085_s9 + $0x38] sm:$0xff]  ;;  %v789_v14 = vld [vmem:[%s1085_s9 + $0x10] sm:$0xff] }
  0x13   :  { %212 = vmatpush.bf16.msra.mxu0 %v767_v6  ;;  %351 = vst [vmem:[#allocation1] ss:$2 sm:$0xff] %v349_v54  ;;  %v348_v4 = vld [vmem:[%s1078_s2] sm:$0xff]  ;;  %v801_v6 = vld [vmem:[%s1085_s9 + $0x70] sm:$0xff]  ;;  %v790_v12 = vld [vmem:[%s1085_s9 + $0x18] sm:$0xff] }
  0x14   :  { %226 = vmatpush.bf16.msra.mxu1 %v775_v7  ;;  %v793_v7 = vld [vmem:[%s1085_s9 + $0x30] sm:$0xff]  ;;  %v798_v13 = vld [vmem:[%s1085_s9 + $0x58] sm:$0xff]  ;;  %v788_v18 = vld [vmem:[%s1085_s9 + $0x8] sm:$0xff] }
  0x15   :  { %280 = vmatpush.bf16.msra.mxu2 %v665_v37  ;;  %293 = vmatpush.bf16.msra.mxu3 %v669_v39  ;;  %v796_v19 = vld [vmem:[%s1085_s9 + $0x48] sm:$0xff]  ;;  %v787_v20 = vld [vmem:[%s1085_s9] sm:$0xff] }
  0x16   :  { %v404_v28 = vld [vmem:[%s1084_s8] sm:$0x3]  ;;  %s867_s8 = smov [#allocation5]  }
  0x17   :  { %213 = vmatpush.bf16.msra.mxu0 %v766_v8  ;;  %v792_v8 = vld [vmem:[%s1085_s9 + $0x28] sm:$0xff]  ;;  %v406_v31 = vperm.slane %v404_v28, 0  ;;  %v407_v32 = vperm.slane %v404_v28, 1  ;;  %s586_s19 = sshll.u32 %s867_s8, 4  ;;  %s587_s19 = int_to_ptr.vmem [resolvable:$true] %s586_s19 }
  0x18   :  { %227 = vmatpush.bf16.msra.mxu1 %v774_v9  ;;  %v800_v9 = vld [vmem:[%s1085_s9 + $0x68] sm:$0xff] }
  0x19   :  { %328 = vmatpush.bf16.msrb.mxu2 %v691_v43  ;;  %341 = vmatpush.bf16.msrb.mxu3 %v695_v47  ;;  %v807_v43 = vld [vmem:[%s1086_s10] ss:$0 sm:$0xff] }
  0x1a   :  { %v352_v62 = vld.sshfl [vmem:[#allocation1] sm:$0xff pattern:$0x75316420]  ;;  %v353_v63 = vld.sshfl [vmem:[#allocation1 + $0x8] sm:$0xff pattern:$0x75316420] }
  0x1b   :  { %214 = vmatpush.bf16.msra.mxu0 %v765_v10  ;;  %v791_v10 = vld [vmem:[%s1085_s9 + $0x20] sm:$0xff] }
  0x1c   :  { %228 = vmatpush.bf16.msra.mxu1 %v773_v11  ;;  %v799_v11 = vld [vmem:[%s1085_s9 + $0x60] sm:$0xff] }
  0x1d   :  { %329 = vmatpush.bf16.msrb.mxu2 %v683_v50  ;;  %342 = vmatpush.bf16.msrb.mxu3 %v687_v51 }
  0x1f   :  { %215 = vmatpush.bf16.msra.mxu0 %v764_v15  ;;  %v797_v15 = vld [vmem:[%s1085_s9 + $0x50] sm:$0xff] }
  0x20   :  { %229 = vmatpush.bf16.msra.mxu1 %v772_v16 }
  0x23   :  { %216 = vmatpush.bf16.msra.mxu0 %v763_v21  ;;  %v795_v21 = vld [vmem:[%s1085_s9 + $0x40] sm:$0xff] }
  0x24   :  { %230 = vmatpush.bf16.msra.mxu1 %v771_v22 }
  0x26   :  { %217 = vmatmul.bf16.vlgmr.msra.gmra.mxu0 %v71_v26 }
  0x27   :  { %231 = vmatmul.bf16.vlgmr.msra.gmra.mxu1 %v75_v27  ;;  %544 = vmatpush.bf16.msrb.mxu0 %v794_v5 }
  0x28   :  { %558 = vmatpush.bf16.msrb.mxu1 %v801_v6 }
  0x2b   :  { %545 = vmatpush.bf16.msrb.mxu0 %v793_v7 }
  0x2c   :  { %559 = vmatpush.bf16.msrb.mxu1 %v800_v9 }
  0x2f   :  { %546 = vmatpush.bf16.msrb.mxu0 %v792_v8 }
  0x30   :  { %560 = vmatpush.bf16.msrb.mxu1 %v799_v11 }
  0x33   :  { %547 = vmatpush.bf16.msrb.mxu0 %v791_v10 }
  0x34   :  { %561 = vmatpush.bf16.msrb.mxu1 %v798_v13 }
  0x37   :  { %548 = vmatpush.bf16.msrb.mxu0 %v790_v12 }
  0x38   :  { %562 = vmatpush.bf16.msrb.mxu1 %v797_v15 }
  0x3b   :  { %549 = vmatpush.bf16.msrb.mxu0 %v789_v14 }
  0x3c   :  { %563 = vmatpush.bf16.msrb.mxu1 %v796_v19 }
  0x3f   :  { %550 = vmatpush.bf16.msrb.mxu0 %v788_v18 }
  0x40   :  { %564 = vmatpush.bf16.msrb.mxu1 %v795_v21 }
  0x43   :  { %551 = vmatpush.bf16.msrb.mxu0 %v787_v20 }
  0xa3   :  { %v218_v52 = vpop.f32.mrf.mxu0 }
  0xa4   :  { %v232_v53 = vpop.f32.mrf.mxu1  ;;  %v219_v0 = vadd.f32 %v806_v55, %v218_v52 }
  0xa6   :  { %v233_v1 = vadd.f32 %v232_v53, %v219_v0 }
  0xa8   :  { %v237_v2 = vmax.f32 %v233_v1, 0.0 }
  0xaa   :  { %v239_v3 = vpack.c.bf16 %v237_v2, %v237_v2 }
  0xab   :  { %v220_v56 = vpop.f32.mrf.mxu0 }
  0xac   :  { %v221_v57 = vadd.f32 %v806_v55, %v220_v56  ;;  %v234_v58 = vpop.f32.mrf.mxu1 }
  0xae   :  { %v235_v59 = vadd.f32 %v234_v58, %v221_v57 }
  0xb0   :  { %v238_v60 = vmax.f32 %v235_v59, 0.0 }
  0xb2   :  { %v240_v61 = vpack.c.bf16 %v238_v60, %v238_v60 }
  0xb4   :  { %678 = vmatmul.msk.bf16.vlgmr.msra.gmra.mxu2 %vm269_vm1, %v240_v61  ;;  %679 = vmatmul.msk.bf16.vlgmr.msra.gmra.mxu3 %vm269_vm1, %v240_v61 }
  0xb5   :  { %698 = vmatpush.msk.msra.mxu2 %vm68_vm0, %v352_v62  ;;  %700 = vmatpush.msk.msra.mxu3 %vm68_vm0, %v353_v63 }
  0xc4   :  { %696 = vmatmul.msk.bf16.vlgmr.msrb.gmra.mxu2 %vm269_vm1, %v239_v3  ;;  %697 = vmatmul.msk.bf16.vlgmr.msrb.gmra.mxu3 %vm269_vm1, %v239_v3 }
  0xd4   :  { %699 = vmatmul.msk.f32.vlgmr.msra.gmra.mxu2 %vm354_vm2, %v348_v4  ;;  %701 = vmatmul.msk.f32.vlgmr.msra.gmra.mxu3 %vm354_vm2, %v348_v4 }
 0x137   :  { %v282_v16 = vpop.f32.mrf.mxu2  ;;  %v295_v17 = vpop.f32.mrf.mxu3 }
 0x13f   :  { %v284_v22 = vpop.f32.mrf.mxu2  ;;  %v297_v23 = vpop.f32.mrf.mxu3 }
 0x147   :  { %v331_v24 = vpop.f32.mrf.mxu2  ;;  %v344_v25 = vpop.f32.mrf.mxu3 }
 0x148   :  { %v332_v29 = vadd.f32 %v331_v24, %v282_v16  ;;  %v345_v30 = vadd.f32 %v344_v25, %v295_v17 }
 0x14f   :  { %v333_v26 = vpop.f32.mrf.mxu2  ;;  %v346_v27 = vpop.f32.mrf.mxu3 }
 0x157   :  { %v379_v33 = vpop.f32.mrf.mxu2  ;;  %v399_v34 = vpop.f32.mrf.mxu3 }
 0x158   :  { %v402_v35 = vadd.f32 %v379_v33, %v332_v29  ;;  %v403_v36 = vadd.f32 %v399_v34, %v345_v30 }
 0x15a   :  { %v410_v37 = vadd.f32 %v406_v31, %v402_v35  ;;  %v411_v38 = vadd.f32 %v407_v32, %v403_v36 }
 0x15c   :  { %v412_v39 = vmax.f32 %v410_v37, 0.0  ;;  %v413_v40 = vmax.f32 %v411_v38, 0.0 }
 0x15e   :  { %v414_v41 = vpack.c.bf16 %v412_v39, %v412_v39  ;;  %v415_v42 = vpack.c.bf16 %v413_v40, %v413_v40 }
 0x160   :  { %552 = vmatmul.bf16.vlgmr.msrb.gmra.mxu0 %v414_v41  ;;  %762 = vmatmul.msk.bf16.vlgmr.msrb.gmra.mxu1 %vm540_vm3, %v415_v42 }
 0x1dd   :  { %v553_v44 = vpop.f32.mrf.mxu0  ;;  %v566_v45 = vpop.f32.mrf.mxu1 }
 0x1de   :  { %v554_v46 = vadd.f32 %v807_v43, %v553_v44 }
 0x1e0   :  { %v567_v47 = vadd.f32 %v566_v45, %v554_v46 }
 0x1e2   :  { %570 = vmax.xlane.f32.xlu0 %v567_v47 }
 0x1e5   :  { %v555_v48 = vpop.f32.mrf.mxu0  ;;  %v568_v49 = vpop.f32.mrf.mxu1 }
 0x255   :  { %v571_v50 = vpop.xlane.xlu0 %570 }
 0x256   :  { %v572_v51 = vsub.f32 %v567_v47, %v571_v50 }
 0x258   :  { %v573_v52 = vmul.f32 1.442695, %v572_v51 }
 0x25a   :  { %808 = vpow2.f32 %v573_v52 }
 0x260   :  { %v809_v53 = vpop.eup %808 }
 0x261   :  { %575 = vadd.xlane.f32.xlu0 %v809_v53 }
 0x2d4   :  { %v576_v54 = vpop.xlane.xlu0 %575 }
 0x2d5   :  { %810 = vlog2.f32 %v576_v54 }
 0x2db   :  { %v811_v55 = vpop.eup %810 }
 0x2dc   :  { %v578_v56 = vmul.f32 0.6931472, %v811_v55 }
 0x2de   :  { %v579_v57 = vsub.f32 %v572_v51, %v578_v56 }
 0x2e0   :  { %580 = vst [vmem:[#allocation5] sm:$0xff] %v579_v57 }
 0x2e1   :  { %591 = dma.vmem_to_hbm [thread:$0]  %s587_s19, 128, %s589_s20, [#allocation4]  }
 0x2e2   :  { %862 = dma.done.wait [#allocation4], 128  }
 0x2e3   :  { %863 = vsyncadd [#allocation4], 4294967168 }
 0x2e4   :  { %596 = vsyncpa [#allocation3], 1 }
 0x2e5   :  { %597 = vsyncpa [#allocation4], 1 }

</bundles_post_ra>
